<compile_context>
chip_gen: v5e
topology: v5e:2x2
jax: 0.10.0
libtpu: 0.0.40
codegen_flags: <defaults>
</compile_context>

<pallas_src>
import jax
import jax.numpy as jnp
from jax import lax
from jax.experimental import pallas as pl
from jax.experimental.pallas import tpu as pltpu

LANE = 128
HALO = 16          # leading halo rows = one bf16 sublane tile (max pad is 3)
PADMAX = 3         # largest 'same' padding in the block (k=7 -> pad 3)
SUB_BF16 = 16      # bf16 sublane tile


# ---------------------------------------------------------------------------
# Wrapper: PyTorch-layout in/out, weight/activation prep, pallas_call
# ---------------------------------------------------------------------------
def mpbd_block(x_ncl, params, *, batch_block=8):
    """x_ncl: (N, Cin, L) float32 (torch Conv1d layout) -> (N, Cout, L) f32."""
    N, Cin, L = x_ncl.shape
    Cout = params["w1a"].shape[0]
    Cp = pl.cdiv(Cout, LANE) * LANE          # lane-dense padded channel count
    Lt = pl.cdiv(L, SUB_BF16) * SUB_BF16     # sublane-aligned interior length
    Lp = HALO + Lt + PADMAX                  # haloed scratch length

    # >= 2 grid steps whenever N >= 2 so v7x megacore keeps both cores busy.
    NB = max(1, min(batch_block, pl.cdiv(N, 2)))
    n_chunks = pl.cdiv(N, NB)
    Np = n_chunks * NB

    # ---- activations: NCL -> NLC, batch/length pad, single K=5 im2col ------
    x_nlc = jnp.transpose(x_ncl, (0, 2, 1)).astype(jnp.float32)
    x_nlc = jnp.pad(x_nlc, ((0, Np - N), (0, Lt - L), (0, 0)))
    xp = jnp.pad(x_nlc, ((0, 0), (2, 2), (0, 0)))            # 'same' pad, K=5
    x5 = jnp.concatenate([xp[:, k:k + Lt, :] for k in range(5)],
                         axis=-1).astype(jnp.bfloat16)        # (Np, Lt, 5*Cin)

    # ---- fused first-layer weight (5*Cin, 3*Cp) + fused bias (1, 3*Cp) -----
    w1a = params["w1a"].astype(jnp.float32)                   # (Cout, Cin, 3)
    w2a = params["w2a"].astype(jnp.float32)                   # (Cout, Cin, 5)
    wf3 = jnp.zeros((5, Cin, 3 * Cp), jnp.float32)
    for k in range(3):                                        # branch1 conv3 (pad 1)
        wf3 = wf3.at[k + 1, :, 0:Cout].set(w1a[:, :, k].T)
    for k in range(5):                                        # branch2 conv5 (pad 2)
        wf3 = wf3.at[k, :, Cp:Cp + Cout].set(w2a[:, :, k].T)
    if "wd" in params:                                        # 1x1 downsample
        wf3 = wf3.at[2, :, 2 * Cp:2 * Cp + Cout].set(
            params["wd"].astype(jnp.float32)[:, :, 0].T)
        bd = params["bd"].astype(jnp.float32)
    else:                                                     # identity (Cin == Cout)
        wf3 = wf3.at[2, :, 2 * Cp:2 * Cp + Cin].set(jnp.eye(Cin, dtype=jnp.float32))
        bd = jnp.zeros((Cout,), jnp.float32)
    wf = wf3.reshape(5 * Cin, 3 * Cp).astype(jnp.bfloat16)

    def pad_b(b):
        return jnp.pad(b.astype(jnp.float32), (0, Cp - Cout))

    bf = jnp.concatenate([pad_b(params["b1a"]), pad_b(params["b2a"]),
                          pad_b(bd)])[None, :]                # (1, 3*Cp) f32
    b2 = jnp.stack([pad_b(params["b1b"]), pad_b(params["b2b"])], axis=0)  # (2, Cp)

    # ---- second-layer weights: torch (Co, Ci, K) -> (K, Cp, Cp) bf16 -------
    def prep_w2(w):
        co, ci, k = w.shape
        wt = jnp.transpose(w.astype(jnp.float32), (2, 1, 0))  # (K, Ci, Co)
        wt = jnp.pad(wt, ((0, 0), (0, Cp - ci), (0, Cp - co)))
        return wt.astype(jnp.bfloat16)

    w1b = prep_w2(params["w1b"])                              # (3, Cp, Cp)
    w2b = prep_w2(params["w2b"])                              # (7, Cp, Cp)

    # ---------------------------------------------------------------------
    # Kernel (closure over static shape constants)
    # ---------------------------------------------------------------------
    def kernel(x5_ref, wf_ref, w1b_ref, w2b_ref, bf_ref, b2_ref,
               o_ref, mid1_ref, mid2_ref):
        def mm(a, w):
            return lax.dot_general(a, w,
                                   dimension_numbers=(((2,), (0,)), ((), ())),
                                   preferred_element_type=jnp.float32)

        # Fused first layer: conv3 | conv5 | downsample in one wide matmul.
        y = mm(x5_ref[...], wf_ref[...]) + bf_ref[0, :][None, None, :]

        # Downsample seeds the output block (accumulated in place below).
        o_ref[...] = y[:, :, 2 * Cp:3 * Cp].astype(o_ref.dtype)

        # Branch intermediates -> bf16 haloed scratch (aligned full-tile store).
        mid1_ref[:, HALO:HALO + Lt, :] = jnp.maximum(y[:, :, 0:Cp], 0.0).astype(jnp.bfloat16)
        mid2_ref[:, HALO:HALO + Lt, :] = jnp.maximum(y[:, :, Cp:2 * Cp], 0.0).astype(jnp.bfloat16)

        # Zero only the halo (+ length-padding) rows, unconditionally per step
        # (scratch is per-core under megacore; do NOT gate on program_id == 0).
        for m in (mid1_ref, mid2_ref):
            m[:, 0:HALO, :] = jnp.zeros((NB, HALO, Cp), jnp.bfloat16)
            m[:, HALO + L:, :] = jnp.zeros((NB, Lp - HALO - L, Cp), jnp.bfloat16)

        # Second layer: 'same' conv as per-tap accumulating matmuls (no slab).
        def conv_same(mid_ref, w_ref, K, bidx):
            s = HALO - (K - 1) // 2
            acc = mm(mid_ref[:, s:s + Lt, :], w_ref[0])
            for k in range(1, K):
                acc = acc + mm(mid_ref[:, s + k:s + k + Lt, :], w_ref[k])
            return jnp.maximum(acc + b2_ref[bidx, :][None, None, :], 0.0)

        o_ref[...] += conv_same(mid1_ref, w1b_ref, 3, 0)
        o_ref[...] += conv_same(mid2_ref, w2b_ref, 7, 1)

    # ---------------------------------------------------------------------
    def const_spec(shape):
        nd = len(shape)
        return pl.BlockSpec(tuple(shape), lambda b, _nd=nd: (0,) * _nd)

    out = pl.pallas_call(
        kernel,
        out_shape=jax.ShapeDtypeStruct((Np, Lt, Cp), jnp.float32),
        grid=(n_chunks,),
        in_specs=[
            pl.BlockSpec((NB, Lt, 5 * Cin), lambda b: (b, 0, 0)),
            const_spec(wf.shape), const_spec(w1b.shape), const_spec(w2b.shape),
            const_spec(bf.shape), const_spec(b2.shape),
        ],
        out_specs=pl.BlockSpec((NB, Lt, Cp), lambda b: (b, 0, 0)),
        scratch_shapes=[pltpu.VMEM((NB, Lp, Cp), jnp.bfloat16),
                        pltpu.VMEM((NB, Lp, Cp), jnp.bfloat16)],
        compiler_params=pltpu.CompilerParams(
            dimension_semantics=("parallel",),
            vmem_limit_bytes=64 * 1024 * 1024),
    )(x5, wf, w1b, w2b, bf, b2)

    # Drop channel / length / batch padding, back to torch NCL layout.
    return jnp.transpose(out[:N, :L, :Cout], (0, 2, 1))


# ---------------------------------------------------------------------------
# Pure-JAX reference (lax.conv) for validation
# ---------------------------------------------------------------------------
def _ref_conv1d(x, w, b, pad):
    y = lax.conv_general_dilated(
        x, w, window_strides=(1,), padding=[(pad, pad)],
        dimension_numbers=("NCH", "OIH", "NCH"))
    return y + b[None, :, None]


def mpbd_block_ref(x, p):
    r = jax.nn.relu
    b1 = r(_ref_conv1d(x, p["w1a"], p["b1a"], 1))
    b1 = r(_ref_conv1d(b1, p["w1b"], p["b1b"], 1))
    b2 = r(_ref_conv1d(x, p["w2a"], p["b2a"], 2))
    b2 = r(_ref_conv1d(b2, p["w2b"], p["b2b"], 3))
    ds = _ref_conv1d(x, p["wd"], p["bd"], 0) if "wd" in p else x
    return b1 + b2 + ds


# ---------------------------------------------------------------------------
def make_params(key, cin, cout):
    ks = jax.random.split(key, 10)
    mk_w = lambda k, co, ci, ksz: jax.random.normal(k, (co, ci, ksz), jnp.float32) * 0.1
    mk_b = lambda k, co: jax.random.normal(k, (co,), jnp.float32) * 0.1
    return {
        "w1a": mk_w(ks[0], cout, cin, 3), "b1a": mk_b(ks[1], cout),
        "w1b": mk_w(ks[2], cout, cout, 3), "b1b": mk_b(ks[3], cout),
        "w2a": mk_w(ks[4], cout, cin, 5), "b2a": mk_b(ks[5], cout),
        "w2b": mk_w(ks[6], cout, cout, 7), "b2b": mk_b(ks[7], cout),
        # downsample 1x1 conv (input_channel != output_channel case)
        "wd": mk_w(ks[8], cout, cin, 1), "bd": mk_b(ks[9], cout),
    }


if __name__ == "__main__":
    key = jax.random.PRNGKey(0)
    # Two configs: the small baseline, plus Cout > 128 / odd L / odd N to cover
    # multi-tile Cp, sublane-padded L and batch padding (per the review).
    for (N, Cin, Cout, L) in [(2, 4, 8, 16), (3, 5, 130, 13)]:
        key, kx, kp = jax.random.split(key, 3)
        x = jax.random.normal(kx, (N, Cin, L), jnp.float32)
        params = make_params(kp, Cin, Cout)

        out = jax.block_until_ready(jax.jit(mpbd_block)(x, params))
        ref = jax.block_until_ready(mpbd_block_ref(x, params))

        assert out.shape == (N, Cout, L)
        max_err = float(jnp.max(jnp.abs(out - ref)))
        # bf16 MXU inputs -> loosened tolerance vs the f32 reference.
        assert jnp.allclose(out, ref, atol=5e-2, rtol=5e-2), (
            f"mismatch vs reference at {(N, Cin, Cout, L)} (max err {max_err})")
    print("KERNEL_OK")
</pallas_src>

<mosaic_0001>
module attributes {stable_mosaic.version = 11 : i64} {
  func.func @kernel(%arg0: i32, %arg1: memref<1x16x20xbf16, #tpu.memory_space<vmem>>, %arg2: memref<20x384xbf16, #tpu.memory_space<vmem>>, %arg3: memref<3x128x128xbf16, #tpu.memory_space<vmem>>, %arg4: memref<7x128x128xbf16, #tpu.memory_space<vmem>>, %arg5: memref<1x384xf32, #tpu.memory_space<vmem>>, %arg6: memref<2x128xf32, #tpu.memory_space<vmem>>, %arg7: memref<1x16x128xf32, #tpu.memory_space<vmem>>, %arg8: memref<1x35x128xbf16, #tpu.memory_space<vmem>>, %arg9: memref<1x35x128xbf16, #tpu.memory_space<vmem>>) attributes {dimension_semantics = [#tpu.dimension_semantics<parallel>], iteration_bounds = array<i64: 2>, scalar_prefetch = 0 : i64, scratch_operands = 2 : i64, tpu.core_type = #tpu.core_type<tc>, window_params = [{transform_indices = @transform_0, window_bounds = array<i64: 1, 16, 20>}, {pipeline_mode = #tpu.pipeline_mode<synchronous>, transform_indices = @transform_1, window_bounds = array<i64: 20, 384>}, {pipeline_mode = #tpu.pipeline_mode<synchronous>, transform_indices = @transform_2, window_bounds = array<i64: 3, 128, 128>}, {pipeline_mode = #tpu.pipeline_mode<synchronous>, transform_indices = @transform_3, window_bounds = array<i64: 7, 128, 128>}, {pipeline_mode = #tpu.pipeline_mode<synchronous>, transform_indices = @transform_4, window_bounds = array<i64: 1, 384>}, {pipeline_mode = #tpu.pipeline_mode<synchronous>, transform_indices = @transform_5, window_bounds = array<i64: 2, 128>}, {transform_indices = @transform_6, window_bounds = array<i64: 1, 16, 128>}]} {
    %c0 = arith.constant 0 : index
    %c0_0 = arith.constant 0 : index
    %c0_1 = arith.constant 0 : index
    %0 = vector.load %arg1[%c0, %c0_0, %c0_1] : memref<1x16x20xbf16, #tpu.memory_space<vmem>>, vector<1x16x20xbf16>
    %c0_2 = arith.constant 0 : index
    %c0_3 = arith.constant 0 : index
    %1 = vector.load %arg2[%c0_2, %c0_3] : memref<20x384xbf16, #tpu.memory_space<vmem>>, vector<20x384xbf16>
    %cst = arith.constant dense<0.000000e+00> : vector<1x16x384xf32>
    %2 = tpu.matmul %0, %1, %cst {dimension_numbers = #tpu.dot_dimension_numbers<[2], [0], [0, 1], [1], [0, 0, 0, 1, 1, 1], [], []>} : vector<1x16x20xbf16>, vector<20x384xbf16>, vector<1x16x384xf32> -> vector<1x16x384xf32>
    %c0_4 = arith.constant 0 : index
    %c0_5 = arith.constant 0 : index
    %3 = vector.load %arg5[%c0_4, %c0_5] : memref<1x384xf32, #tpu.memory_space<vmem>>, vector<1x384xf32>
    %4 = vector.shape_cast %3 : vector<1x384xf32> to vector<384xf32>
    %5 = vector.shape_cast %4 : vector<384xf32> to vector<1x1x384xf32>
    %6 = vector.broadcast %5 : vector<1x1x384xf32> to vector<1x16x384xf32>
    %7 = arith.addf %2, %6 : vector<1x16x384xf32>
    %8 = vector.extract_strided_slice %7 {offsets = [0, 0, 256], sizes = [1, 16, 128], strides = [1, 1, 1]} : vector<1x16x384xf32> to vector<1x16x128xf32>
    %c0_6 = arith.constant 0 : index
    %c0_7 = arith.constant 0 : index
    %c0_8 = arith.constant 0 : index
    %9 = vector.load %arg7[%c0_6, %c0_7, %c0_8] : memref<1x16x128xf32, #tpu.memory_space<vmem>>, vector<1x16x128xf32>
    tpu.vector_store %arg7[%c0_6, %c0_7, %c0_8], %8 {strides = array<i32>} : memref<1x16x128xf32, #tpu.memory_space<vmem>>, vector<1x16x128xf32>,
    %10 = vector.extract_strided_slice %7 {offsets = [0, 0, 0], sizes = [1, 16, 128], strides = [1, 1, 1]} : vector<1x16x384xf32> to vector<1x16x128xf32>
    %cst_9 = arith.constant 0.000000e+00 : f32
    %11 = vector.broadcast %cst_9 : f32 to vector<1x16x128xf32>
    %12 = arith.maximumf %10, %11 : vector<1x16x128xf32>
    %13 = arith.truncf %12 : vector<1x16x128xf32> to vector<1x16x128xbf16>
    %c0_10 = arith.constant 0 : index
    %c16 = arith.constant 16 : index
    %c0_11 = arith.constant 0 : index
    %14 = vector.load %arg8[%c0_10, %c16, %c0_11] : memref<1x35x128xbf16, #tpu.memory_space<vmem>>, vector<1x16x128xbf16>
    tpu.vector_store %arg8[%c0_10, %c16, %c0_11], %13 {strides = array<i32>} : memref<1x35x128xbf16, #tpu.memory_space<vmem>>, vector<1x16x128xbf16>,
    %15 = vector.extract_strided_slice %7 {offsets = [0, 0, 128], sizes = [1, 16, 128], strides = [1, 1, 1]} : vector<1x16x384xf32> to vector<1x16x128xf32>
    %cst_12 = arith.constant 0.000000e+00 : f32
    %16 = vector.broadcast %cst_12 : f32 to vector<1x16x128xf32>
    %17 = arith.maximumf %15, %16 : vector<1x16x128xf32>
    %18 = arith.truncf %17 : vector<1x16x128xf32> to vector<1x16x128xbf16>
    %c0_13 = arith.constant 0 : index
    %c16_14 = arith.constant 16 : index
    %c0_15 = arith.constant 0 : index
    %19 = vector.load %arg9[%c0_13, %c16_14, %c0_15] : memref<1x35x128xbf16, #tpu.memory_space<vmem>>, vector<1x16x128xbf16>
    tpu.vector_store %arg9[%c0_13, %c16_14, %c0_15], %18 {strides = array<i32>} : memref<1x35x128xbf16, #tpu.memory_space<vmem>>, vector<1x16x128xbf16>,
    %cst_16 = arith.constant 0.000000e+00 : bf16
    %20 = vector.broadcast %cst_16 : bf16 to vector<1x16x128xbf16>
    %c0_17 = arith.constant 0 : index
    %c0_18 = arith.constant 0 : index
    %c0_19 = arith.constant 0 : index
    %21 = vector.load %arg8[%c0_17, %c0_18, %c0_19] : memref<1x35x128xbf16, #tpu.memory_space<vmem>>, vector<1x16x128xbf16>
    tpu.vector_store %arg8[%c0_17, %c0_18, %c0_19], %20 {strides = array<i32>} : memref<1x35x128xbf16, #tpu.memory_space<vmem>>, vector<1x16x128xbf16>,
    %cst_20 = arith.constant 0.000000e+00 : bf16
    %22 = vector.broadcast %cst_20 : bf16 to vector<1x3x128xbf16>
    %c0_21 = arith.constant 0 : index
    %c32 = arith.constant 32 : index
    %c0_22 = arith.constant 0 : index
    %23 = vector.load %arg8[%c0_21, %c32, %c0_22] : memref<1x35x128xbf16, #tpu.memory_space<vmem>>, vector<1x3x128xbf16>
    tpu.vector_store %arg8[%c0_21, %c32, %c0_22], %22 {strides = array<i32>} : memref<1x35x128xbf16, #tpu.memory_space<vmem>>, vector<1x3x128xbf16>,
    %cst_23 = arith.constant 0.000000e+00 : bf16
    %24 = vector.broadcast %cst_23 : bf16 to vector<1x16x128xbf16>
    %c0_24 = arith.constant 0 : index
    %c0_25 = arith.constant 0 : index
    %c0_26 = arith.constant 0 : index
    %25 = vector.load %arg9[%c0_24, %c0_25, %c0_26] : memref<1x35x128xbf16, #tpu.memory_space<vmem>>, vector<1x16x128xbf16>
    tpu.vector_store %arg9[%c0_24, %c0_25, %c0_26], %24 {strides = array<i32>} : memref<1x35x128xbf16, #tpu.memory_space<vmem>>, vector<1x16x128xbf16>,
    %cst_27 = arith.constant 0.000000e+00 : bf16
    %26 = vector.broadcast %cst_27 : bf16 to vector<1x3x128xbf16>
    %c0_28 = arith.constant 0 : index
    %c32_29 = arith.constant 32 : index
    %c0_30 = arith.constant 0 : index
    %27 = vector.load %arg9[%c0_28, %c32_29, %c0_30] : memref<1x35x128xbf16, #tpu.memory_space<vmem>>, vector<1x3x128xbf16>
    tpu.vector_store %arg9[%c0_28, %c32_29, %c0_30], %26 {strides = array<i32>} : memref<1x35x128xbf16, #tpu.memory_space<vmem>>, vector<1x3x128xbf16>,
    %c0_31 = arith.constant 0 : index
    %c0_32 = arith.constant 0 : index
    %c0_33 = arith.constant 0 : index
    %28 = vector.load %arg7[%c0_31, %c0_32, %c0_33] : memref<1x16x128xf32, #tpu.memory_space<vmem>>, vector<1x16x128xf32>
    %c0_34 = arith.constant 0 : index
    %c15 = arith.constant 15 : index
    %c0_35 = arith.constant 0 : index
    %29 = vector.load %arg8[%c0_34, %c15, %c0_35] : memref<1x35x128xbf16, #tpu.memory_space<vmem>>, vector<1x16x128xbf16>
    %c0_36 = arith.constant 0 : index
    %c0_37 = arith.constant 0 : index
    %c0_38 = arith.constant 0 : index
    %30 = vector.load %arg3[%c0_36, %c0_37, %c0_38] : memref<3x128x128xbf16, #tpu.memory_space<vmem>>, vector<1x128x128xbf16>
    %31 = vector.shape_cast %30 : vector<1x128x128xbf16> to vector<128x128xbf16>
    %cst_39 = arith.constant dense<0.000000e+00> : vector<1x16x128xf32>
    %32 = tpu.matmul %29, %31, %cst_39 {dimension_numbers = #tpu.dot_dimension_numbers<[2], [0], [0, 1], [1], [0, 0, 0, 1, 1, 1], [], []>} : vector<1x16x128xbf16>, vector<128x128xbf16>, vector<1x16x128xf32> -> vector<1x16x128xf32>
    %c0_40 = arith.constant 0 : index
    %c16_41 = arith.constant 16 : index
    %c0_42 = arith.constant 0 : index
    %33 = vector.load %arg8[%c0_40, %c16_41, %c0_42] : memref<1x35x128xbf16, #tpu.memory_space<vmem>>, vector<1x16x128xbf16>
    %c1 = arith.constant 1 : index
    %c0_43 = arith.constant 0 : index
    %c0_44 = arith.constant 0 : index
    %34 = vector.load %arg3[%c1, %c0_43, %c0_44] : memref<3x128x128xbf16, #tpu.memory_space<vmem>>, vector<1x128x128xbf16>
    %35 = vector.shape_cast %34 : vector<1x128x128xbf16> to vector<128x128xbf16>
    %cst_45 = arith.constant dense<0.000000e+00> : vector<1x16x128xf32>
    %36 = tpu.matmul %33, %35, %cst_45 {dimension_numbers = #tpu.dot_dimension_numbers<[2], [0], [0, 1], [1], [0, 0, 0, 1, 1, 1], [], []>} : vector<1x16x128xbf16>, vector<128x128xbf16>, vector<1x16x128xf32> -> vector<1x16x128xf32>
    %37 = arith.addf %32, %36 : vector<1x16x128xf32>
    %c0_46 = arith.constant 0 : index
    %c17 = arith.constant 17 : index
    %c0_47 = arith.constant 0 : index
    %38 = vector.load %arg8[%c0_46, %c17, %c0_47] : memref<1x35x128xbf16, #tpu.memory_space<vmem>>, vector<1x16x128xbf16>
    %c2 = arith.constant 2 : index
    %c0_48 = arith.constant 0 : index
    %c0_49 = arith.constant 0 : index
    %39 = vector.load %arg3[%c2, %c0_48, %c0_49] : memref<3x128x128xbf16, #tpu.memory_space<vmem>>, vector<1x128x128xbf16>
    %40 = vector.shape_cast %39 : vector<1x128x128xbf16> to vector<128x128xbf16>
    %cst_50 = arith.constant dense<0.000000e+00> : vector<1x16x128xf32>
    %41 = tpu.matmul %38, %40, %cst_50 {dimension_numbers = #tpu.dot_dimension_numbers<[2], [0], [0, 1], [1], [0, 0, 0, 1, 1, 1], [], []>} : vector<1x16x128xbf16>, vector<128x128xbf16>, vector<1x16x128xf32> -> vector<1x16x128xf32>
    %42 = arith.addf %37, %41 : vector<1x16x128xf32>
    %c0_51 = arith.constant 0 : index
    %c0_52 = arith.constant 0 : index
    %43 = vector.load %arg6[%c0_51, %c0_52] : memref<2x128xf32, #tpu.memory_space<vmem>>, vector<1x128xf32>
    %44 = vector.shape_cast %43 : vector<1x128xf32> to vector<128xf32>
    %45 = vector.shape_cast %44 : vector<128xf32> to vector<1x1x128xf32>
    %46 = vector.broadcast %45 : vector<1x1x128xf32> to vector<1x16x128xf32>
    %47 = arith.addf %42, %46 : vector<1x16x128xf32>
    %cst_53 = arith.constant 0.000000e+00 : f32
    %48 = vector.broadcast %cst_53 : f32 to vector<1x16x128xf32>
    %49 = arith.maximumf %47, %48 : vector<1x16x128xf32>
    %50 = arith.addf %28, %49 : vector<1x16x128xf32>
    %c0_54 = arith.constant 0 : index
    %c0_55 = arith.constant 0 : index
    %c0_56 = arith.constant 0 : index
    %51 = vector.load %arg7[%c0_54, %c0_55, %c0_56] : memref<1x16x128xf32, #tpu.memory_space<vmem>>, vector<1x16x128xf32>
    tpu.vector_store %arg7[%c0_54, %c0_55, %c0_56], %50 {strides = array<i32>} : memref<1x16x128xf32, #tpu.memory_space<vmem>>, vector<1x16x128xf32>,
    %c0_57 = arith.constant 0 : index
    %c0_58 = arith.constant 0 : index
    %c0_59 = arith.constant 0 : index
    %52 = vector.load %arg7[%c0_57, %c0_58, %c0_59] : memref<1x16x128xf32, #tpu.memory_space<vmem>>, vector<1x16x128xf32>
    %c0_60 = arith.constant 0 : index
    %c13 = arith.constant 13 : index
    %c0_61 = arith.constant 0 : index
    %53 = vector.load %arg9[%c0_60, %c13, %c0_61] : memref<1x35x128xbf16, #tpu.memory_space<vmem>>, vector<1x16x128xbf16>
    %c0_62 = arith.constant 0 : index
    %c0_63 = arith.constant 0 : index
    %c0_64 = arith.constant 0 : index
    %54 = vector.load %arg4[%c0_62, %c0_63, %c0_64] : memref<7x128x128xbf16, #tpu.memory_space<vmem>>, vector<1x128x128xbf16>
    %55 = vector.shape_cast %54 : vector<1x128x128xbf16> to vector<128x128xbf16>
    %cst_65 = arith.constant dense<0.000000e+00> : vector<1x16x128xf32>
    %56 = tpu.matmul %53, %55, %cst_65 {dimension_numbers = #tpu.dot_dimension_numbers<[2], [0], [0, 1], [1], [0, 0, 0, 1, 1, 1], [], []>} : vector<1x16x128xbf16>, vector<128x128xbf16>, vector<1x16x128xf32> -> vector<1x16x128xf32>
    %c0_66 = arith.constant 0 : index
    %c14 = arith.constant 14 : index
    %c0_67 = arith.constant 0 : index
    %57 = vector.load %arg9[%c0_66, %c14, %c0_67] : memref<1x35x128xbf16, #tpu.memory_space<vmem>>, vector<1x16x128xbf16>
    %c1_68 = arith.constant 1 : index
    %c0_69 = arith.constant 0 : index
    %c0_70 = arith.constant 0 : index
    %58 = vector.load %arg4[%c1_68, %c0_69, %c0_70] : memref<7x128x128xbf16, #tpu.memory_space<vmem>>, vector<1x128x128xbf16>
    %59 = vector.shape_cast %58 : vector<1x128x128xbf16> to vector<128x128xbf16>
    %cst_71 = arith.constant dense<0.000000e+00> : vector<1x16x128xf32>
    %60 = tpu.matmul %57, %59, %cst_71 {dimension_numbers = #tpu.dot_dimension_numbers<[2], [0], [0, 1], [1], [0, 0, 0, 1, 1, 1], [], []>} : vector<1x16x128xbf16>, vector<128x128xbf16>, vector<1x16x128xf32> -> vector<1x16x128xf32>
    %61 = arith.addf %56, %60 : vector<1x16x128xf32>
    %c0_72 = arith.constant 0 : index
    %c15_73 = arith.constant 15 : index
    %c0_74 = arith.constant 0 : index
    %62 = vector.load %arg9[%c0_72, %c15_73, %c0_74] : memref<1x35x128xbf16, #tpu.memory_space<vmem>>, vector<1x16x128xbf16>
    %c2_75 = arith.constant 2 : index
    %c0_76 = arith.constant 0 : index
    %c0_77 = arith.constant 0 : index
    %63 = vector.load %arg4[%c2_75, %c0_76, %c0_77] : memref<7x128x128xbf16, #tpu.memory_space<vmem>>, vector<1x128x128xbf16>
    %64 = vector.shape_cast %63 : vector<1x128x128xbf16> to vector<128x128xbf16>
    %cst_78 = arith.constant dense<0.000000e+00> : vector<1x16x128xf32>
    %65 = tpu.matmul %62, %64, %cst_78 {dimension_numbers = #tpu.dot_dimension_numbers<[2], [0], [0, 1], [1], [0, 0, 0, 1, 1, 1], [], []>} : vector<1x16x128xbf16>, vector<128x128xbf16>, vector<1x16x128xf32> -> vector<1x16x128xf32>
    %66 = arith.addf %61, %65 : vector<1x16x128xf32>
    %c0_79 = arith.constant 0 : index
    %c16_80 = arith.constant 16 : index
    %c0_81 = arith.constant 0 : index
    %67 = vector.load %arg9[%c0_79, %c16_80, %c0_81] : memref<1x35x128xbf16, #tpu.memory_space<vmem>>, vector<1x16x128xbf16>
    %c3 = arith.constant 3 : index
    %c0_82 = arith.constant 0 : index
    %c0_83 = arith.constant 0 : index
    %68 = vector.load %arg4[%c3, %c0_82, %c0_83] : memref<7x128x128xbf16, #tpu.memory_space<vmem>>, vector<1x128x128xbf16>
    %69 = vector.shape_cast %68 : vector<1x128x128xbf16> to vector<128x128xbf16>
    %cst_84 = arith.constant dense<0.000000e+00> : vector<1x16x128xf32>
    %70 = tpu.matmul %67, %69, %cst_84 {dimension_numbers = #tpu.dot_dimension_numbers<[2], [0], [0, 1], [1], [0, 0, 0, 1, 1, 1], [], []>} : vector<1x16x128xbf16>, vector<128x128xbf16>, vector<1x16x128xf32> -> vector<1x16x128xf32>
    %71 = arith.addf %66, %70 : vector<1x16x128xf32>
    %c0_85 = arith.constant 0 : index
    %c17_86 = arith.constant 17 : index
    %c0_87 = arith.constant 0 : index
    %72 = vector.load %arg9[%c0_85, %c17_86, %c0_87] : memref<1x35x128xbf16, #tpu.memory_space<vmem>>, vector<1x16x128xbf16>
    %c4 = arith.constant 4 : index
    %c0_88 = arith.constant 0 : index
    %c0_89 = arith.constant 0 : index
    %73 = vector.load %arg4[%c4, %c0_88, %c0_89] : memref<7x128x128xbf16, #tpu.memory_space<vmem>>, vector<1x128x128xbf16>
    %74 = vector.shape_cast %73 : vector<1x128x128xbf16> to vector<128x128xbf16>
    %cst_90 = arith.constant dense<0.000000e+00> : vector<1x16x128xf32>
    %75 = tpu.matmul %72, %74, %cst_90 {dimension_numbers = #tpu.dot_dimension_numbers<[2], [0], [0, 1], [1], [0, 0, 0, 1, 1, 1], [], []>} : vector<1x16x128xbf16>, vector<128x128xbf16>, vector<1x16x128xf32> -> vector<1x16x128xf32>
    %76 = arith.addf %71, %75 : vector<1x16x128xf32>
    %c0_91 = arith.constant 0 : index
    %c18 = arith.constant 18 : index
    %c0_92 = arith.constant 0 : index
    %77 = vector.load %arg9[%c0_91, %c18, %c0_92] : memref<1x35x128xbf16, #tpu.memory_space<vmem>>, vector<1x16x128xbf16>
    %c5 = arith.constant 5 : index
    %c0_93 = arith.constant 0 : index
    %c0_94 = arith.constant 0 : index
    %78 = vector.load %arg4[%c5, %c0_93, %c0_94] : memref<7x128x128xbf16, #tpu.memory_space<vmem>>, vector<1x128x128xbf16>
    %79 = vector.shape_cast %78 : vector<1x128x128xbf16> to vector<128x128xbf16>
    %cst_95 = arith.constant dense<0.000000e+00> : vector<1x16x128xf32>
    %80 = tpu.matmul %77, %79, %cst_95 {dimension_numbers = #tpu.dot_dimension_numbers<[2], [0], [0, 1], [1], [0, 0, 0, 1, 1, 1], [], []>} : vector<1x16x128xbf16>, vector<128x128xbf16>, vector<1x16x128xf32> -> vector<1x16x128xf32>
    %81 = arith.addf %76, %80 : vector<1x16x128xf32>
    %c0_96 = arith.constant 0 : index
    %c19 = arith.constant 19 : index
    %c0_97 = arith.constant 0 : index
    %82 = vector.load %arg9[%c0_96, %c19, %c0_97] : memref<1x35x128xbf16, #tpu.memory_space<vmem>>, vector<1x16x128xbf16>
    %c6 = arith.constant 6 : index
    %c0_98 = arith.constant 0 : index
    %c0_99 = arith.constant 0 : index
    %83 = vector.load %arg4[%c6, %c0_98, %c0_99] : memref<7x128x128xbf16, #tpu.memory_space<vmem>>, vector<1x128x128xbf16>
    %84 = vector.shape_cast %83 : vector<1x128x128xbf16> to vector<128x128xbf16>
    %cst_100 = arith.constant dense<0.000000e+00> : vector<1x16x128xf32>
    %85 = tpu.matmul %82, %84, %cst_100 {dimension_numbers = #tpu.dot_dimension_numbers<[2], [0], [0, 1], [1], [0, 0, 0, 1, 1, 1], [], []>} : vector<1x16x128xbf16>, vector<128x128xbf16>, vector<1x16x128xf32> -> vector<1x16x128xf32>
    %86 = arith.addf %81, %85 : vector<1x16x128xf32>
    %c1_101 = arith.constant 1 : index
    %c0_102 = arith.constant 0 : index
    %87 = vector.load %arg6[%c1_101, %c0_102] : memref<2x128xf32, #tpu.memory_space<vmem>>, vector<1x128xf32>
    %88 = vector.shape_cast %87 : vector<1x128xf32> to vector<128xf32>
    %89 = vector.shape_cast %88 : vector<128xf32> to vector<1x1x128xf32>
    %90 = vector.broadcast %89 : vector<1x1x128xf32> to vector<1x16x128xf32>
    %91 = arith.addf %86, %90 : vector<1x16x128xf32>
    %cst_103 = arith.constant 0.000000e+00 : f32
    %92 = vector.broadcast %cst_103 : f32 to vector<1x16x128xf32>
    %93 = arith.maximumf %91, %92 : vector<1x16x128xf32>
    %94 = arith.addf %52, %93 : vector<1x16x128xf32>
    %c0_104 = arith.constant 0 : index
    %c0_105 = arith.constant 0 : index
    %c0_106 = arith.constant 0 : index
    %95 = vector.load %arg7[%c0_104, %c0_105, %c0_106] : memref<1x16x128xf32, #tpu.memory_space<vmem>>, vector<1x16x128xf32>
    tpu.vector_store %arg7[%c0_104, %c0_105, %c0_106], %94 {strides = array<i32>} : memref<1x16x128xf32, #tpu.memory_space<vmem>>, vector<1x16x128xf32>,
    return
  }
  func.func @transform_0(%arg0: i32) -> (i32, i32, i32) {
    %c0_i32 = arith.constant 0 : i32
    %c0_i32_0 = arith.constant 0 : i32
    %c0_i32_1 = arith.constant 0 : i32
    return %arg0, %c0_i32, %c0_i32_0 : i32, i32, i32
  }
  func.func @transform_1(%arg0: i32) -> (i32, i32) {
    %c0_i32 = arith.constant 0 : i32
    %c0_i32_0 = arith.constant 0 : i32
    %c0_i32_1 = arith.constant 0 : i32
    return %c0_i32, %c0_i32_0 : i32, i32
  }
  func.func @transform_2(%arg0: i32) -> (i32, i32, i32) {
    %c0_i32 = arith.constant 0 : i32
    %c0_i32_0 = arith.constant 0 : i32
    %c0_i32_1 = arith.constant 0 : i32
    %c0_i32_2 = arith.constant 0 : i32
    return %c0_i32, %c0_i32_0, %c0_i32_1 : i32, i32, i32
  }
  func.func @transform_3(%arg0: i32) -> (i32, i32, i32) {
    %c0_i32 = arith.constant 0 : i32
    %c0_i32_0 = arith.constant 0 : i32
    %c0_i32_1 = arith.constant 0 : i32
    %c0_i32_2 = arith.constant 0 : i32
    return %c0_i32, %c0_i32_0, %c0_i32_1 : i32, i32, i32
  }
  func.func @transform_4(%arg0: i32) -> (i32, i32) {
    %c0_i32 = arith.constant 0 : i32
    %c0_i32_0 = arith.constant 0 : i32
    %c0_i32_1 = arith.constant 0 : i32
    return %c0_i32, %c0_i32_0 : i32, i32
  }
  func.func @transform_5(%arg0: i32) -> (i32, i32) {
    %c0_i32 = arith.constant 0 : i32
    %c0_i32_0 = arith.constant 0 : i32
    %c0_i32_1 = arith.constant 0 : i32
    return %c0_i32, %c0_i32_0 : i32, i32
  }
  func.func @transform_6(%arg0: i32) -> (i32, i32, i32) {
    %c0_i32 = arith.constant 0 : i32
    %c0_i32_0 = arith.constant 0 : i32
    %c0_i32_1 = arith.constant 0 : i32
    return %arg0, %c0_i32, %c0_i32_0 : i32, i32, i32
  }
}

</mosaic_0001>

<bundles_post_ra>
// kernel: mpbd_block.1
= control target key start
LH: loop header
LB: loop body
LE: loop exit
PB: predicated region body
PF: predicated region fallthrough
CT: control target
= control target key end

     0   :  { %s2090_s21 = smov 0   ;;  %s2405_s0 = inlined_call_operand.vmem [shape: bf16[2,16,20], index: 0, kind: input, shape index: {}]   ;;  %s2406_s1 = inlined_call_operand.vmem [shape: bf16[20,384], index: 1, kind: input, shape index: {}]   ;;  %s2407_s2 = inlined_call_operand.vmem [shape: bf16[3,128,128], index: 2, kind: input, shape index: {}]   ;;  %s2408_s3 = inlined_call_operand.vmem [shape: bf16[7,128,128], index: 3, kind: input, shape index: {}]   ;;  %s2409_s4 = inlined_call_operand.vmem [shape: f32[1,384], index: 4, kind: input, shape index: {}]   ;;  %s2410_s5 = inlined_call_operand.vmem [shape: f32[2,128], index: 5, kind: input, shape index: {}]   ;;  %s2411_s6 = inlined_call_operand.vmem [shape: f32[2,16,128], index: 6, kind: output, shape index: {}]  }
   0x1 LB: > { %s1436_s22 = sadd.s32 4294967295, %s2052_s21   ;;  %p1440_p0 = scmp.ge.s32.totalorder %s2052_s21, 1  ;;  %s2052_s21 = sphi %s2090_s21, %s16_s21  }
   0x2   : > { %p212_p1 = scmp.lt.s32.totalorder %s2052_s21, 3 }
   0x4   : > { %p213_p2 = pnand %p1440_p0, %p212_p1 }
   0x5   : > { %p242_p3 = scmp.lt.s32.totalorder (!%p213_p2), %s1436_s22, 1 }
   0x6   : > { %216 = sbr.rel (%p213_p2) target bundleno = 367 (0x16f), region = 44 }
   0xb   : > { %v259_v0 = vld [vmem:[%s2406_s1 + $0x18] sm:$0x33]  ;;  %vm302_vm0 = vcmask 1041408   ;;  %vm371_vm1 = vsmask.f32 1280  ;;  %s2413_s22 = smov (!%p242_p3, %s1436_s22), 1 }
   0xc   : > { %v286_v1 = vunpack.c.l.b16 %v259_v0  ;;  %vm372_vm2 = vmand %vm302_vm0, %vm371_vm1  ;;  %v373_v2 = vld [vmem:[#allocation2 + $0x10] sm:$0x3]  ;;  %v378_v3 = vld [vmem:[#allocation3 + $0x10] sm:$0x3]  ;;  %v287_v4 = vunpack.c.h.b16 %v259_v0  ;;  %s1918_s9 = sshll.u32 %s2413_s22, 3  ;;  %vm298_vm3 = vcmask 162816  }
   0xd   : > { %v374_v5 = vsel %vm372_vm2, 0, %v373_v2  ;;  %v379_v6 = vsel %vm372_vm2, 0, %v378_v3  ;;  %v1451_v7 = vld [vmem:[%s2406_s1] sm:$0xf]  ;;  %v1922_v9 = vld [vmem:[%s2406_s1 + $0x8] sm:$0xf0]  ;;  %s246_s14 = scalar_lea.vmem %s2405_s0, %s1918_s9 }
   0xe   : > { %v292_v8 = vpack.c.b16 %v286_v1, %v286_v1  ;;  %375 = vst [vmem:[#allocation2 + $0x10] sm:$0x3] %v374_v5  ;;  %v1939_v10 = vld [vmem:[%s2407_s2 + $0x78] sm:$0xff]  ;;  %v293_v11 = vpack.c.b16 %v287_v4, %v287_v4  ;;  %v1938_v14 = vld [vmem:[%s2407_s2 + $0x70] sm:$0xff]  ;;  %v1452_v15 = vor.u32 %v1922_v9, %v1451_v7  ;;  %v1921_v18 = vld [vmem:[%s2406_s1 + $0x4] sm:$0xf] }
   0xf   : > { %380 = vst [vmem:[#allocation3 + $0x10] sm:$0x3] %v379_v6  ;;  %v1931_v12 = vld [vmem:[%s2407_s2 + $0x38] sm:$0xff]  ;;  %473 = vmatpush.bf16.msra.mxu3 %v1939_v10  ;;  %v1930_v16 = vld [vmem:[%s2407_s2 + $0x30] sm:$0xff]  ;;  %v1920_v20 = vld [vmem:[%s246_s14] sm:$0xff]  ;;  %v2054_v63 = vmov 0  }
  0x10   : > { %v304_v13 = vsel %vm302_vm0, %v292_v8, 0  ;;  %558 = vmatpush.bf16.msra.mxu0 %v1931_v12  ;;  %v307_v17 = vsel %vm302_vm0, %v293_v11, 0  ;;  %v1453_v19 = vld [vmem:[%s2406_s1 + $0xc] sm:$0xf0]  ;;  %v1937_v21 = vld [vmem:[%s2407_s2 + $0x68] sm:$0xff]  ;;  %v1948_v26 = vld [vmem:[%s2407_s2 + $0xb8] sm:$0xff] }
  0x11   : > { %318 = vmatpush.bf16.msra.mxu1 %v304_v13  ;;  %v260_v22 = vld [vmem:[%s2406_s1 + $0x20] sm:$0x3]  ;;  %v1929_v23 = vld [vmem:[%s2407_s2 + $0x28] sm:$0xff]  ;;  %v1456_v25 = vor.u32 %v1921_v18, %v1453_v19  ;;  %v1947_v31 = vld [vmem:[%s2407_s2 + $0xb0] sm:$0xff]  ;;  %369 = vst [vmem:[#allocation2 + $0x4] sm:$0xf] %v2054_v63 }
  0x12   : > { %v288_v24 = vunpack.c.l.b16 %v260_v22  ;;  %v1936_v28 = vld [vmem:[%s2407_s2 + $0x60] sm:$0xff]  ;;  %v1935_v32 = vld [vmem:[%s2407_s2 + $0x58] sm:$0xff]  ;;  %v1946_v34 = vld [vmem:[%s2407_s2 + $0xa8] sm:$0xff]  ;;  %377 = vst [vmem:[#allocation3 + $0x4] sm:$0xf] %v2054_v63  ;;  %vm735_vm6 = vcmask 1044480  }
  0x13   : > { %474 = vmatpush.bf16.msra.mxu3 %v1938_v14  ;;  %v1928_v29 = vld [vmem:[%s2407_s2 + $0x20] sm:$0xff]  ;;  %v1927_v33 = vld [vmem:[%s2407_s2 + $0x18] sm:$0xff]  ;;  %v1934_v35 = vld [vmem:[%s2407_s2 + $0x50] sm:$0xff]  ;;  %vm600_vm4 = vsmask.f32 7424  ;;  %vm1198_vm8 = vcmask 1046528  }
  0x14   : > { %559 = vmatpush.bf16.msra.mxu0 %v1930_v16  ;;  %v294_v27 = vpack.c.b16 %v288_v24, %v288_v24  ;;  %v1926_v36 = vld [vmem:[%s2407_s2 + $0x10] sm:$0xff]  ;;  %v1945_v37 = vld [vmem:[%s2407_s2 + $0xa0] sm:$0xff]  ;;  %v1459_v38 = vld [vmem:[%s2406_s1 + $0x8] sm:$0xf]  ;;  %vm491_vm5 = vsmask.f32 4352 }
  0x15   : > { %319 = vmatpush.bf16.msra.mxu1 %v1452_v15  ;;  %v1923_v39 = vld [vmem:[%s2406_s1 + $0x10] sm:$0xf0]  ;;  %v1933_v41 = vld [vmem:[%s2407_s2 + $0x48] sm:$0xff]  ;;  %v1964_v43 = vld [vmem:[%s2408_s3 + $0x78] sm:$0xff]  ;;  %vm805_vm7 = vsmask.f32 5376 }
  0x16   : > { %v310_v30 = vsel %vm302_vm0, %v294_v27, 0  ;;  %v1460_v40 = vor.u32 %v1923_v39, %v1459_v38  ;;  %v1925_v42 = vld [vmem:[%s2407_s2 + $0x8] sm:$0xff]  ;;  %v1944_v44 = vld [vmem:[%s2407_s2 + $0x98] sm:$0xff]  ;;  %v1932_v45 = vld [vmem:[%s2407_s2 + $0x40] sm:$0xff]  ;;  %vm1288_vm9 = vsmask.f32 6400 }
  0x17   : > { %475 = vmatpush.bf16.msra.mxu3 %v1937_v21  ;;  %346 = vmatpush.bf16.msra.mxu2 %v310_v30  ;;  %v1924_v46 = vld [vmem:[%s2407_s2] sm:$0xff]  ;;  %v1963_v47 = vld [vmem:[%s2408_s3 + $0x70] sm:$0xff]  ;;  %v1956_v48 = vld [vmem:[%s2408_s3 + $0x38] sm:$0xff]  ;;  %s1919_s9 = sshll.u32 %s2413_s22, 4 }
  0x18   : > { %1461 = vmatmul.msk.bf16.vlgmr.msra.gmra.mxu1 %vm298_vm3, %v1920_v20  ;;  %560 = vmatpush.bf16.msra.mxu0 %v1929_v23  ;;  %v1972_v49 = vld [vmem:[%s2408_s3 + $0xb8] sm:$0xff]  ;;  %v1943_v50 = vld [vmem:[%s2407_s2 + $0x90] sm:$0xff]  ;;  %v1962_v51 = vld [vmem:[%s2408_s3 + $0x68] sm:$0xff]  ;;  %s251_s12 = scalar_lea.vmem %s2411_s6, %s1919_s9 }
  0x19   : > { %332 = vmatpush.bf16.msrb.mxu1 %v307_v17  ;;  %v1955_v52 = vld [vmem:[%s2408_s3 + $0x30] sm:$0xff]  ;;  %v1942_v54 = vld [vmem:[%s2407_s2 + $0x88] sm:$0xff]  ;;  %v1961_v55 = vld [vmem:[%s2408_s3 + $0x60] sm:$0xff] }
  0x1a   : > { %v1971_v53 = vld [vmem:[%s2408_s3 + $0xb0] sm:$0xff]  ;;  %v1954_v56 = vld [vmem:[%s2408_s3 + $0x28] sm:$0xff]  ;;  %v1941_v58 = vld [vmem:[%s2407_s2 + $0x80] sm:$0xff] }
  0x1b   : > { %476 = vmatpush.bf16.msra.mxu3 %v1936_v28  ;;  %347 = vmatpush.bf16.msra.mxu2 %v1460_v40  ;;  %v1970_v57 = vld [vmem:[%s2408_s3 + $0xa8] sm:$0xff]  ;;  %v1980_v59 = vld [vmem:[%s2408_s3 + $0xf8] sm:$0xff]  ;;  %v1953_v61 = vld [vmem:[%s2408_s3 + $0x20] sm:$0xff] }
  0x1c   : > { %561 = vmatpush.bf16.msra.mxu0 %v1928_v29  ;;  %v1960_v60 = vld [vmem:[%s2408_s3 + $0x58] sm:$0xff]  ;;  %v1969_v62 = vld [vmem:[%s2408_s3 + $0xa0] sm:$0xff]  ;;  %v1979_v0 = vld [vmem:[%s2408_s3 + $0xf0] sm:$0xff] }
  0x1d   : > { %333 = vmatpush.bf16.msrb.mxu1 %v1456_v25  ;;  %v1959_v1 = vld [vmem:[%s2408_s3 + $0x50] sm:$0xff]  ;;  %v1952_v2 = vld [vmem:[%s2408_s3 + $0x18] sm:$0xff]  ;;  %v1978_v4 = vld [vmem:[%s2408_s3 + $0xe8] sm:$0xff] }
  0x1e   : > { %1463 = vmatmul.msk.bf16.vlgmr.msra.gmra.mxu2 %vm298_vm3, %v1920_v20  ;;  %v1968_v3 = vld [vmem:[%s2408_s3 + $0x98] sm:$0xff]  ;;  %v1958_v5 = vld [vmem:[%s2408_s3 + $0x48] sm:$0xff]  ;;  %v1951_v6 = vld [vmem:[%s2408_s3 + $0x10] sm:$0xff] }
  0x1f   : > { %477 = vmatpush.bf16.msra.mxu3 %v1935_v32  ;;  %788 = vmatpush.bf16.msrb.mxu2 %v1964_v43  ;;  %v1967_v7 = vld [vmem:[%s2408_s3 + $0x90] sm:$0xff]  ;;  %v1977_v8 = vld [vmem:[%s2408_s3 + $0xe0] sm:$0xff]  ;;  %v1950_v10 = vld [vmem:[%s2408_s3 + $0x8] sm:$0xff] }
  0x20   : > { %562 = vmatpush.bf16.msra.mxu0 %v1927_v33  ;;  %v1957_v9 = vld [vmem:[%s2408_s3 + $0x40] sm:$0xff]  ;;  %v1966_v11 = vld [vmem:[%s2408_s3 + $0x88] sm:$0xff]  ;;  %v1988_v12 = vld [vmem:[%s2408_s3 + $0x138] sm:$0xff] }
  0x21   : > { %662 = vmatpush.bf16.msra.mxu1 %v1948_v26  ;;  %v1976_v13 = vld [vmem:[%s2408_s3 + $0xd8] sm:$0xff]  ;;  %v2294_v14 = vld [vmem:[%s2409_s4] sm:$0x7]  ;;  %v1987_v18 = vld [vmem:[%s2408_s3 + $0x130] sm:$0xff] }
  0x22   : > { %v1949_v16 = vld [vmem:[%s2408_s3] sm:$0xff]  ;;  %v1975_v19 = vld [vmem:[%s2408_s3 + $0xd0] sm:$0xff]  ;;  %v1986_v21 = vld [vmem:[%s2408_s3 + $0x128] sm:$0xff]  ;;  %v264_v40 = vperm.slane %v2294_v14, 1 }
  0x23   : > { %478 = vmatpush.bf16.msra.mxu3 %v1934_v35  ;;  %789 = vmatpush.bf16.msrb.mxu2 %v1963_v47  ;;  %v1965_v17 = vld [vmem:[%s2408_s3 + $0x80] sm:$0xff]  ;;  %v1974_v22 = vld [vmem:[%s2408_s3 + $0xc8] sm:$0xff]  ;;  %v574_v30 = vld [vmem:[#allocation2 + $0x10] sm:$0x1] }
  0x24   : > { %563 = vmatpush.bf16.msra.mxu0 %v1926_v36  ;;  %v1985_v25 = vld [vmem:[%s2408_s3 + $0x120] sm:$0xff]  ;;  %v1984_v33 = vld [vmem:[%s2408_s3 + $0x118] sm:$0xff]  ;;  %v1994_v43 = vld [vmem:[%s2408_s3 + $0x168] sm:$0xff] }
  0x25   : > { %663 = vmatpush.bf16.msra.mxu1 %v1947_v31  ;;  %v1973_v27 = vld [vmem:[%s2408_s3 + $0xc0] sm:$0xff]  ;;  %v1996_v31 = vld [vmem:[%s2408_s3 + $0x178] sm:$0xff] }
  0x27   : > { %479 = vmatpush.bf16.msra.mxu3 %v1933_v41  ;;  %790 = vmatpush.bf16.msrb.mxu2 %v1962_v51  ;;  %v1982_v51 = vld [vmem:[%s2408_s3 + $0x108] sm:$0xff] }
  0x28   : > { %1462 = vmatmul.msk.bf16.vlgmr.msrb.gmra.mxu1 %vm298_vm3, %v1920_v20  ;;  %564 = vmatpush.bf16.msra.mxu0 %v1925_v42  ;;  %v263_v20 = vperm.slane %v2294_v14, 0  ;;  %v2028_v42 = vld [vmem:[#allocation2 + $0x4] sm:$0x8] }
  0x29   : > { %664 = vmatpush.bf16.msra.mxu1 %v1946_v34  ;;  %v597_v34 = vunpack.c.l.b16 %v574_v30  ;;  %v2001_v30 = vld [vmem:[%s2408_s3 + $0x1a0] sm:$0xff] }
  0x2b   : > { %480 = vmatpush.bf16.msra.mxu3 %v1932_v45  ;;  %791 = vmatpush.bf16.msrb.mxu2 %v1961_v55  ;;  %v599_v39 = vpack.c.b16 %v597_v34, %v597_v34  ;;  %v1983_v45 = vld [vmem:[%s2408_s3 + $0x110] sm:$0xff]  ;;  %v1993_v55 = vld [vmem:[%s2408_s3 + $0x160] sm:$0xff] }
  0x2c   : > { %565 = vmatpush.bf16.msra.mxu0 %v1924_v46 }
  0x2d   : > { %665 = vmatpush.bf16.msra.mxu1 %v1945_v37  ;;  %v1995_v37 = vld [vmem:[%s2408_s3 + $0x170] sm:$0xff]  ;;  %v609_v47 = vshll.u32 %v599_v39, 16 }
  0x2f   : > { %872 = vmatpush.bf16.msrb.mxu3 %v1956_v48  ;;  %792 = vmatpush.bf16.msrb.mxu2 %v1960_v60 }
  0x30   : > { %973 = vmatpush.bf16.msrb.mxu0 %v1972_v49 }
  0x31   : > { %666 = vmatpush.bf16.msra.mxu1 %v1944_v44 }
  0x33   : > { %873 = vmatpush.bf16.msrb.mxu3 %v1955_v52  ;;  %793 = vmatpush.bf16.msrb.mxu2 %v1959_v1 }
  0x34   : > { %974 = vmatpush.bf16.msrb.mxu0 %v1971_v53 }
  0x35   : > { %667 = vmatpush.bf16.msra.mxu1 %v1943_v50 }
  0x37   : > { %874 = vmatpush.bf16.msrb.mxu3 %v1954_v56  ;;  %794 = vmatpush.bf16.msrb.mxu2 %v1958_v5  ;;  %v1992_v5 = vld [vmem:[%s2408_s3 + $0x158] sm:$0xff] }
  0x38   : > { %975 = vmatpush.bf16.msrb.mxu0 %v1970_v57 }
  0x39   : > { %668 = vmatpush.bf16.msra.mxu1 %v1942_v54 }
  0x3b   : > { %875 = vmatpush.bf16.msrb.mxu3 %v1953_v61  ;;  %795 = vmatpush.bf16.msrb.mxu2 %v1957_v9  ;;  %v2004_v9 = vld [vmem:[%s2408_s3 + $0x1b8] sm:$0xff] }
  0x3c   : > { %976 = vmatpush.bf16.msrb.mxu0 %v1969_v62  ;;  %v611_v62 = vrot.slane %v609_v47, 1  ;;  %v1267_v47 = vld [vmem:[#allocation3 + $0x10] sm:$0x3] }
  0x3d   : > { %669 = vmatpush.bf16.msra.mxu1 %v1941_v58 }
  0x3f   : > { %876 = vmatpush.bf16.msrb.mxu3 %v1952_v2  ;;  %1161 = vmatpush.bf16.msra.mxu2 %v1988_v12  ;;  %v1991_v12 = vld [vmem:[%s2408_s3 + $0x150] sm:$0xff] }
  0x40   : > { %977 = vmatpush.bf16.msrb.mxu0 %v1968_v3  ;;  %v1981_v3 = vld [vmem:[%s2408_s3 + $0x100] sm:$0xff] }
  0x41   : > { %1056 = vmatpush.bf16.msrb.mxu1 %v1980_v59 }
  0x43   : > { %877 = vmatpush.bf16.msrb.mxu3 %v1951_v6  ;;  %1162 = vmatpush.bf16.msra.mxu2 %v1987_v18  ;;  %v2002_v18 = vld [vmem:[%s2408_s3 + $0x1a8] sm:$0xff] }
  0x44   : > { %978 = vmatpush.bf16.msrb.mxu0 %v1967_v7 }
  0x45   : > { %1057 = vmatpush.bf16.msrb.mxu1 %v1979_v0 }
  0x47   : > { %878 = vmatpush.bf16.msrb.mxu3 %v1950_v10  ;;  %1163 = vmatpush.bf16.msra.mxu2 %v1986_v21 }
  0x48   : > { %979 = vmatpush.bf16.msrb.mxu0 %v1966_v11 }
  0x49   : > { %1058 = vmatpush.bf16.msrb.mxu1 %v1978_v4 }
  0x4b   : > { %879 = vmatpush.bf16.msrb.mxu3 %v1949_v16  ;;  %1164 = vmatpush.bf16.msra.mxu2 %v1985_v25  ;;  %v690_v16 = vld [vmem:[#allocation3 + $0x4] sm:$0xc] }
  0x4c   : > { %980 = vmatpush.bf16.msrb.mxu0 %v1965_v17  ;;  %v1990_v17 = vld [vmem:[%s2408_s3 + $0x148] sm:$0xff] }
  0x4d   : > { %1059 = vmatpush.bf16.msrb.mxu1 %v1977_v8 }
  0x4f   : > { %1165 = vmatpush.bf16.msra.mxu2 %v1984_v33 }
  0x51   : > { %1060 = vmatpush.bf16.msrb.mxu1 %v1976_v13  ;;  %v2003_v13 = vld [vmem:[%s2408_s3 + $0x1b0] sm:$0xff] }
  0x53   : > { %1166 = vmatpush.bf16.msra.mxu2 %v1983_v45 }
  0x55   : > { %1061 = vmatpush.bf16.msrb.mxu1 %v1975_v19 }
  0x57   : > { %1167 = vmatpush.bf16.msra.mxu2 %v1982_v51 }
  0x59   : > { %1062 = vmatpush.bf16.msrb.mxu1 %v1974_v22 }
  0x5b   : > { %1168 = vmatpush.bf16.msra.mxu2 %v1981_v3 }
  0x5d   : > { %1063 = vmatpush.bf16.msrb.mxu1 %v1973_v27  ;;  %v1989_v27 = vld [vmem:[%s2408_s3 + $0x140] sm:$0xff] }
  0x95   : > { %v321_v15 = vpop.f32.mrf.mxu1 }
  0x96   : > { %v322_v23 = vadd.f32 %v321_v15, %v263_v20  ;;  %v709_v15 = vld [vmem:[#allocation3 + $0x4] sm:$0x8] }
  0x97   : > { %v730_v19 = vunpack.c.l.b16 %v709_v15 }
  0x98   : > { %v356_v28 = vmax.f32 %v322_v23, 0.0 }
  0x9d   : > { %v323_v24 = vpop.f32.mrf.mxu1 }
  0x9e   : > { %v324_v26 = vadd.f32 %v323_v24, %v263_v20  ;;  %v803_v20 = vunpack.c.l.b16 %v690_v16 }
  0xa0   : > { %v357_v29 = vmax.f32 %v324_v26, 0.0  ;;  %v1074_v26 = vld [vmem:[#allocation3 + $0x10] sm:$0x1] }
  0xa1   : > { %v1097_v33 = vunpack.c.l.b16 %v1074_v26 }
  0xa2   : > { %v2008_v32 = vpack.c.bf16 %v357_v29, %v356_v28 }
  0xa4   : > { %2023 = vst [vmem:[#allocation2 + $0x8] sm:$0xff] %v2008_v32   ;;  %v2018_v35 = vunpack.c.h.b16 %v2008_v32  ;;  %481 = vmatmul.bf16.vlgmr.msra.gmra.mxu3 %v2008_v32 }
  0xa5   : > { %v335_v36 = vpop.f32.mrf.mxu1  ;;  %1251 = vmatpush.bf16.msra.mxu3 %v1996_v31 }
  0xa6   : > { %v490_v38 = vpack.c.b16 %v2018_v35, %v2018_v35  ;;  %v336_v49 = vadd.f32 %v335_v36, %v264_v40 }
  0xa8   : > { %v501_v41 = vshrl.u32 %v490_v38, 16  ;;  %v504_v44 = vshll.u32 %v490_v38, 16  ;;  %v362_v63 = vmax.f32 %v336_v49, 0.0 }
  0xa9   : > { %1252 = vmatpush.bf16.msra.mxu3 %v1995_v37 }
  0xaa   : > { %v503_v52 = vrot.slane %v501_v41, 3  ;;  %v506_v56 = vrot.slane %v504_v44, 4 }
  0xab   : > { %v1940_v46 = vld [vmem:[#allocation2 + $0x8] sm:$0xff] }
  0xac   : > { %v2034_v48 = vld [vmem:[#allocation2 + $0x4] sm:$0xf0]   ;;  %v604_v54 = vshll.u32 %v1940_v46, 16  ;;  %v602_v60 = vshrl.u32 %v1940_v46, 16  ;;  %v507_v8 = vor.u32 %v506_v56, %v503_v52  ;;  %v2000_v46 = vld [vmem:[%s2408_s3 + $0x198] sm:$0xff]  ;;  %v1099_v56 = vpack.c.b16 %v1097_v33, %v1097_v33 }
  0xad   : > { %v2029_v50 = vor.u32 %v2034_v48, %v2028_v42  ;;  %v337_v53 = vpop.f32.mrf.mxu1  ;;  %1253 = vmatpush.bf16.msra.mxu3 %v1994_v43 }
  0xae   : > { %v338_v57 = vadd.f32 %v337_v53, %v264_v40  ;;  %v606_v61 = vrot.slane %v604_v54, 1 }
  0xaf   : > { %v493_v58 = vshrl.u32 %v2029_v50, 16  ;;  %v496_v59 = vshll.u32 %v2029_v50, 16 }
  0xb0   : > { %v363_v0 = vmax.f32 %v338_v57, 0.0  ;;  %v607_v4 = vor.u32 %v606_v61, %v602_v60  ;;  %v1286_v57 = vunpack.c.l.b16 %v1267_v47  ;;  %v1999_v60 = vld [vmem:[%s2408_s3 + $0x190] sm:$0xff]  ;;  %v2044_v47 = vld [vmem:[%s2410_s5] ss:$0 sm:$0xff] }
  0xb1   : > { %v495_v1 = vrot.slane %v493_v58, 3  ;;  %v498_v2 = vrot.slane %v496_v59, 4  ;;  %1254 = vmatpush.bf16.msra.mxu3 %v1993_v55 }
  0xb2   : > { %v2349_v6 = vpack.c.bf16 %v363_v0, %v362_v63  ;;  %v612_v10 = vsel %vm600_vm4, %v607_v4, %v611_v62  ;;  %v1287_v3 = vpack.c.b16 %v1286_v57, %v1286_v57 }
  0xb3   : > { %v499_v7 = vor.u32 %v498_v2, %v495_v1  ;;  %670 = vmatmul.bf16.vlgmr.msra.gmra.mxu1 %v612_v10  ;;  %v1108_v2 = vshll.u32 %v1099_v56, 16 }
  0xb4   : > { %2024 = vst [vmem:[#allocation3 + $0x8] sm:$0xff] %v2349_v6   ;;  %v1103_v61 = vshll.u32 %v2349_v6, 16 }
  0xb5   : > { %v508_v11 = vsel %vm491_vm5, %v499_v7, %v507_v8  ;;  %1255 = vmatpush.bf16.msra.mxu3 %v1992_v5  ;;  %v1998_v5 = vld [vmem:[%s2408_s3 + $0x188] sm:$0xff]  ;;  %v1110_v10 = vrot.slane %v1108_v2, 1 }
  0xb6   : > { %566 = vmatmul.bf16.vlgmr.msra.gmra.mxu0 %v508_v11  ;;  %v1105_v7 = vrot.slane %v1103_v61, 1  ;;  %v1298_v11 = vshrl.u32 %v1287_v3, 16 }
  0xb7   : > { %1355 = vmatpush.bf16.msra.mxu0 %v2004_v9  ;;  %v1101_v9 = vshrl.u32 %v2349_v6, 16 }
  0xb9   : > { %1256 = vmatpush.bf16.msra.mxu3 %v1991_v12  ;;  %v1106_v12 = vor.u32 %v1105_v7, %v1101_v9 }
  0xbb   : > { %1356 = vmatpush.bf16.msra.mxu0 %v2003_v13  ;;  %v691_v21 = vld [vmem:[#allocation3 + $0x8] sm:$0xff]  }
  0xbc   : > { %v692_v22 = vld [vmem:[#allocation3 + $0xc] sm:$0x7]  ;;  %v731_v23 = vunpack.c.l.b16 %v691_v21  ;;  %v905_v25 = vunpack.c.h.b16 %v691_v21  ;;  %v2032_v0 = vld [vmem:[#allocation3 + $0x8] sm:$0xe] }
  0xbd   : > { %v732_v24 = vunpack.c.l.b16 %v692_v22  ;;  %1257 = vmatpush.bf16.msra.mxu3 %v1990_v17  ;;  %v2031_v63 = vld [vmem:[#allocation3 + $0x8] sm:$0xf0]  ;;  %v1301_v17 = vshll.u32 %v1287_v3, 16 }
  0xbe   : > { %v733_v28 = vpack.c.b16 %v731_v23, %v730_v19  ;;  %v804_v31 = vpack.c.b16 %v731_v23, %v803_v20  ;;  %v906_v32 = vpack.c.b16 %v905_v25, %v905_v25  ;;  %v2033_v8 = vor.u32 %v2032_v0, %v2031_v63  ;;  %v1997_v13 = vld [vmem:[%s2408_s3 + $0x180] sm:$0xff] }
  0xbf   : > { %1357 = vmatpush.bf16.msra.mxu0 %v2002_v18  ;;  %v734_v29 = vpack.c.b16 %v732_v24, %v732_v24  ;;  %v1300_v18 = vrot.slane %v1298_v11, 1  ;;  %v1111_v19 = vsel %vm600_vm4, %v1106_v12, %v1110_v10  ;;  %v1303_v22 = vrot.slane %v1301_v17, 2 }
  0xc0   : > { %v736_v34 = vrot.slane %v733_v28, 3  ;;  %v807_v36 = vshrl.u32 %v804_v31, 16  ;;  %v810_v37 = vshll.u32 %v804_v31, 16  ;;  %v908_v40 = vshrl.u32 %v733_v28, 16 }
  0xc1   : > { %v737_v35 = vrot.slane %v734_v29, 3  ;;  %v815_v38 = vshrl.u32 %v734_v29, 16  ;;  %v818_v39 = vshll.u32 %v734_v29, 16  ;;  %v911_v41 = vshll.u32 %v733_v28, 16  ;;  %1258 = vmatpush.bf16.msra.mxu3 %v1989_v27  ;;  %v349_v28 = vpop.f32.mrf.mxu2 }
  0xc2   : > { %v809_v43 = vrot.slane %v807_v36, 2  ;;  %v812_v44 = vrot.slane %v810_v37, 3  ;;  %v916_v45 = vshrl.u32 %v906_v32, 16  ;;  %v910_v50 = vrot.slane %v908_v40, 3 }
  0xc3   : > { %v738_v42 = vsel %vm735_vm6, %v736_v34, %v737_v35  ;;  %1358 = vmatpush.bf16.msra.mxu0 %v2001_v30  ;;  %v817_v48 = vrot.slane %v815_v38, 2  ;;  %v820_v49 = vrot.slane %v818_v39, 3  ;;  %v913_v51 = vrot.slane %v911_v41, 4  ;;  %1064 = vmatmul.bf16.vlgmr.msrb.gmra.mxu1 %v691_v21 }
  0xc4   : > { %796 = vmatmul.bf16.vlgmr.msrb.gmra.mxu2 %v738_v42  ;;  %v813_v52 = vor.u32 %v812_v44, %v809_v43  ;;  %v918_v53 = vrot.slane %v916_v45, 3  ;;  %v919_v54 = vshll.u32 %v906_v32, 16  ;;  %v1290_v15 = vshrl.u32 %v2033_v8, 16 }
  0xc5   : > { %v821_v55 = vor.u32 %v820_v49, %v817_v48  ;;  %v914_v58 = vor.u32 %v913_v51, %v910_v50  ;;  %v1293_v16 = vshll.u32 %v2033_v8, 16  ;;  %v1199_v6 = vrot.slane %v2033_v8, 1 }
  0xc6   : > { %v921_v59 = vrot.slane %v919_v54, 4  ;;  %v1292_v20 = vrot.slane %v1290_v15, 1  ;;  %v1200_v23 = vrot.slane %v1099_v56, 1  ;;  %v1304_v25 = vor.u32 %v1303_v22, %v1300_v18 }
  0xc7   : > { %1359 = vmatpush.bf16.msra.mxu0 %v2000_v46  ;;  %v822_v62 = vsel %vm805_vm7, %v813_v52, %v821_v55  ;;  %v1295_v21 = vrot.slane %v1293_v16, 2  ;;  %v265_v51 = vperm.slane %v2294_v14, 2 }
  0xc8   : > { %880 = vmatmul.bf16.vlgmr.msrb.gmra.mxu3 %v822_v62  ;;  %v922_v1 = vor.u32 %v921_v59, %v918_v53  ;;  %v1201_v26 = vsel %vm1198_vm8, %v1199_v6, %v1200_v23  ;;  %v2045_v59 = vld [vmem:[%s2410_s5 + $0x1] ss:$0 sm:$0xff] }
  0xc9   : > { %v1296_v24 = vor.u32 %v1295_v21, %v1292_v20  ;;  %v351_v31 = vpop.f32.mrf.mxu2 }
  0xca   : > { %v923_v4 = vsel %vm491_vm5, %v914_v58, %v922_v1  ;;  %v352_v15 = vadd.f32 %v351_v31, %v265_v51 }
  0xcb   : > { %1360 = vmatpush.bf16.msra.mxu0 %v1999_v60  ;;  %v1305_v27 = vsel %vm1288_vm9, %v1296_v24, %v1304_v25  ;;  %v350_v60 = vadd.f32 %v349_v28, %v265_v51 }
  0xcc   : > { %981 = vmatmul.bf16.vlgmr.msrb.gmra.mxu0 %v923_v4 }
  0xcf   : > { %1361 = vmatpush.bf16.msra.mxu0 %v1998_v5 }
  0xd3   : > { %1362 = vmatpush.bf16.msra.mxu0 %v1997_v13 }
  0xd4   : > { %1169 = vmatmul.bf16.vlgmr.msra.gmra.mxu2 %v1111_v19 }
  0xd8   : > { %1259 = vmatmul.bf16.vlgmr.msra.gmra.mxu3 %v1201_v26 }
  0xdc   : > { %1363 = vmatmul.bf16.vlgmr.msra.gmra.mxu0 %v1305_v27 }
 0x127   : > { %v482_v30 = vpop.f32.mrf.mxu3 }
 0x12f   : > { %v484_v34 = vpop.f32.mrf.mxu3 }
 0x130   : > { %v671_v33 = vpop.f32.mrf.mxu1 }
 0x133   : > { %v567_v29 = vpop.f32.mrf.mxu0 }
 0x134   : > { %v568_v42 = vadd.f32 %v567_v29, %v482_v30 }
 0x136   : > { %v676_v46 = vadd.f32 %v671_v33, %v568_v42 }
 0x138   : > { %v673_v37 = vpop.f32.mrf.mxu1  ;;  %v680_v52 = vadd.f32 %v2044_v47, %v676_v46 }
 0x13a   : > { %v682_v61 = vmax.f32 %v680_v52, 0.0 }
 0x13b   : > { %v569_v32 = vpop.f32.mrf.mxu0 }
 0x13c   : > { %v570_v53 = vadd.f32 %v569_v32, %v484_v34  ;;  %v684_v3 = vadd.f32 %v682_v61, %v350_v60 }
 0x13e   : > { %v677_v62 = vadd.f32 %v673_v37, %v570_v53 }
 0x140   : > { %v1065_v45 = vpop.f32.mrf.mxu1  ;;  %v681_v4 = vadd.f32 %v2044_v47, %v677_v62 }
 0x142   : > { %v683_v12 = vmax.f32 %v681_v4, 0.0 }
 0x144   : > { %v685_v17 = vadd.f32 %v683_v12, %v352_v15 }
 0x147   : > { %v797_v35 = vpop.f32.mrf.mxu2 }
 0x148   : > { %v1067_v0 = vpop.f32.mrf.mxu1 }
 0x149   : > { %v982_v36 = vpop.f32.mrf.mxu0 }
 0x14b   : > { %v881_v38 = vpop.f32.mrf.mxu3 }
 0x14c   : > { %v882_v40 = vadd.f32 %v881_v38, %v797_v35 }
 0x14e   : > { %v987_v44 = vadd.f32 %v982_v36, %v882_v40 }
 0x14f   : > { %v799_v39 = vpop.f32.mrf.mxu2 }
 0x150   : > { %v1070_v50 = vadd.f32 %v1065_v45, %v987_v44 }
 0x151   : > { %v984_v41 = vpop.f32.mrf.mxu0 }
 0x153   : > { %v883_v43 = vpop.f32.mrf.mxu3 }
 0x154   : > { %v884_v49 = vadd.f32 %v883_v43, %v799_v39 }
 0x156   : > { %v988_v57 = vadd.f32 %v984_v41, %v884_v49 }
 0x157   : > { %v1170_v48 = vpop.f32.mrf.mxu2 }
 0x158   : > { %v1175_v54 = vadd.f32 %v1170_v48, %v1070_v50  ;;  %v1071_v14 = vadd.f32 %v1067_v0, %v988_v57 }
 0x159   : > { %v1364_v55 = vpop.f32.mrf.mxu0 }
 0x15b   : > { %v1260_v56 = vpop.f32.mrf.mxu3 }
 0x15c   : > { %v1265_v58 = vadd.f32 %v1260_v56, %v1175_v54 }
 0x15e   : > { %v1369_v63 = vadd.f32 %v1364_v55, %v1265_v58 }
 0x15f   : > { %v1172_v1 = vpop.f32.mrf.mxu2 }
 0x160   : > { %v1373_v2 = vadd.f32 %v2045_v59, %v1369_v63  ;;  %v1176_v7 = vadd.f32 %v1172_v1, %v1071_v14 }
 0x161   : > { %v1366_v11 = vpop.f32.mrf.mxu0 }
 0x162   : > { %v1375_v5 = vmax.f32 %v1373_v2, 0.0 }
 0x163   : > { %v1262_v8 = vpop.f32.mrf.mxu3 }
 0x164   : > { %v1377_v9 = vadd.f32 %v1375_v5, %v684_v3  ;;  %v1266_v10 = vadd.f32 %v1262_v8, %v1176_v7 }
 0x166   : > { %1379 = vst [vmem:[%s251_s12] sm:$0xff] %v1377_v9  ;;  %v1370_v13 = vadd.f32 %v1366_v11, %v1266_v10 }
 0x168   : > { %v1374_v16 = vadd.f32 %v2045_v59, %v1370_v13 }
 0x16a   : > { %v1376_v18 = vmax.f32 %v1374_v16, 0.0 }
 0x16c   : > { %v1378_v19 = vadd.f32 %v1376_v18, %v685_v17 }
 0x16e   : > { %1380 = vst [vmem:[%s251_s12 + $0x8] sm:$0xff] %v1378_v19 }
 0x16f PF: > { %s16_s21 = sadd.s32 1, %s2052_s21  }
 0x170   : > { %p13_p4 = scmp.ge.s32.totalorder %s16_s21, 4  }
 0x172   :  { %15 = sbr.rel (!%p13_p4) target bundleno = 1 (0x1), region = 82 }

</bundles_post_ra>
